<compile_context>
chip_gen: v6e
topology: v6e:2x2x1
jax: 0.10.0
libtpu: 0.0.40
codegen_flags: <defaults>
</compile_context>

<pallas_src>
import functools
import math

import jax
import jax.numpy as jnp
from jax.experimental import pallas as pl
from jax.experimental.pallas import tpu as pltpu


def _build_pos_emb(n_dim: int, n_step: int) -> jnp.ndarray:
    """Deterministic buffer setup mirroring PositionalEncoding.__init__."""
    position = jnp.arange(n_step, dtype=jnp.float32)                    # (n_step,)
    div_term = jnp.exp(jnp.arange(0, n_dim, 2, dtype=jnp.float32)
                       * (-math.log(10000.0) / n_dim))                  # (n_dim//2,)
    angles = div_term[:, None] * position[None, :]                      # (n_dim//2, n_step)
    pos_emb = jnp.zeros((n_step, n_dim), dtype=jnp.float32)
    pos_emb = pos_emb.at[:, 0::2].set(jnp.sin(angles).T)
    pos_emb = pos_emb.at[:, 1::2].set(jnp.cos(angles).T)
    return pos_emb


def _round_up(x: int, m: int) -> int:
    return (x + m - 1) // m * m


def _gather_kernel(rows_per_step, t_smem, table_hbm, o_ref, sem):
    # t_smem:    (b_pad,) int32 in SMEM (scalar prefetch)
    # table_hbm: (n_step, n_dim) f32 ref left in HBM (memory_space=pl.ANY)
    # o_ref:     (rows_per_step, n_dim) f32 output block in VMEM
    # sem:       single shared DMA semaphore
    base = pl.program_id(0) * rows_per_step

    # Start all row gathers: HBM table row -> output VMEM row. All copies have
    # identical byte counts and signal the same semaphore, so they all stay in
    # flight together.
    for r in range(rows_per_step):
        row = t_smem[base + r]
        pltpu.make_async_copy(
            table_hbm.at[pl.ds(row, 1), :],
            o_ref.at[pl.ds(r, 1), :],
            sem,
        ).start()

    # Wait for all of them; each wait consumes one row's worth of the shared
    # semaphore, so after rows_per_step waits every copy has landed and the
    # output block is fully written before Pallas' epilogue writes it back.
    for r in range(rows_per_step):
        pltpu.make_async_copy(
            table_hbm.at[pl.ds(0, 1), :],        # dummy same-shape src for the wait
            o_ref.at[pl.ds(r, 1), :],
            sem,
        ).wait()


def positional_encoding_lookup(t: jnp.ndarray, pos_emb: jnp.ndarray,
                               *, rows_per_step: int = 64) -> jnp.ndarray:
    """Pallas equivalent of PositionalEncoding.forward(t) for 1-D integer t."""
    assert t.ndim == 1
    B = int(t.shape[0])
    n_step, n_dim = pos_emb.shape

    table = pos_emb.astype(jnp.float32)          # stays in HBM; no per-call padding

    # Row-block size: multiple of 8 sublanes, no larger than the padded batch.
    r = max(8, min(int(rows_per_step) // 8 * 8, _round_up(B, 8)))
    b_pad = _round_up(B, r)
    # Prefer >= 2 grid steps (when the padded batch allows it) so the
    # "parallel" grid axis can split across v7x's two TensorCores.
    if b_pad // r < 2 and (b_pad // 2) >= 8:
        r = (b_pad // 2) // 8 * 8
        b_pad = _round_up(B, r)
    num_blocks = b_pad // r

    # Clamp indices (OOB would otherwise become an out-of-bounds DMA).  Padded
    # batch rows gather table row 0 and are sliced away below.
    t_idx = jnp.clip(t.astype(jnp.int32), 0, n_step - 1)
    t_pad = jnp.zeros((b_pad,), jnp.int32).at[:B].set(t_idx)

    kernel = functools.partial(_gather_kernel, r)
    bytes_accessed = int(2 * b_pad * n_dim * 4 + b_pad * 4)  # rows read + written + idx

    out = pl.pallas_call(
        kernel,
        out_shape=jax.ShapeDtypeStruct((b_pad, n_dim), jnp.float32),
        grid_spec=pltpu.PrefetchScalarGridSpec(
            num_scalar_prefetch=1,
            grid=(num_blocks,),
            in_specs=[pl.BlockSpec(memory_space=pl.ANY)],    # table: raw HBM ref
            out_specs=pl.BlockSpec((r, n_dim), lambda i, t_ref: (i, 0)),
            scratch_shapes=[pltpu.SemaphoreType.DMA],
        ),
        compiler_params=pltpu.CompilerParams(
            dimension_semantics=("parallel",)),
        cost_estimate=pl.CostEstimate(
            flops=0, transcendentals=0, bytes_accessed=bytes_accessed),
    )(t_pad, table)

    return out[:B, :]


if __name__ == "__main__":
    n_dim, n_step, batch = 32, 16, 12   # batch=12 exercises the pad-to-16 path

    pos_emb = _build_pos_emb(n_dim, n_step)

    key = jax.random.PRNGKey(0)
    t = jax.random.randint(key, (batch,), 0, n_step, dtype=jnp.int32)

    out = positional_encoding_lookup(t, pos_emb)
    out = jax.block_until_ready(out)

    # Reference: plain JAX gather, matching pos_emb[t, :].
    ref = pos_emb[t, :]
    assert out.shape == (batch, n_dim)
    assert out.dtype == jnp.float32
    assert jnp.allclose(out, ref, atol=1e-6), "mismatch vs reference gather"

    print("KERNEL_OK")
</pallas_src>

<mosaic_0001>
module attributes {stable_mosaic.version = 11 : i64} {
  func.func @_gather_kernel(%arg0: i32, %arg1: memref<16xi32, #tpu.memory_space<smem>>, %arg2: memref<16x32xf32, #tpu.memory_space<any>>, %arg3: memref<8x32xf32, #tpu.memory_space<vmem>>, %arg4: memref<!tpu.dma_semaphore, #tpu.memory_space<semaphore_mem>>) attributes {dimension_semantics = [#tpu.dimension_semantics<parallel>], iteration_bounds = array<i64: 2>, scalar_prefetch = 1 : i64, scratch_operands = 1 : i64, tpu.core_type = #tpu.core_type<tc>, window_params = [{}, {transform_indices = @transform_1, window_bounds = array<i64: 8, 32>}]} {
    %c8_i32 = arith.constant 8 : i32
    %0 = arith.muli %arg0, %c8_i32 : i32
    %c0_i32 = arith.constant 0 : i32
    %1 = arith.addi %0, %c0_i32 : i32
    %2 = arith.index_cast %1 : i32 to index
    %3 = memref.load %arg1[%2] : memref<16xi32, #tpu.memory_space<smem>>
    %c0_i32_0 = arith.constant 0 : i32
    %4 = tpu.memref_slice %arg2[%3, %c0_i32_0] : memref<16x32xf32, #tpu.memory_space<any>> -> memref<1x32xf32, #tpu.memory_space<any>>
    %c0_i32_1 = arith.constant 0 : i32
    %c0_i32_2 = arith.constant 0 : i32
    %5 = tpu.memref_slice %arg3[%c0_i32_1, %c0_i32_2] : memref<8x32xf32, #tpu.memory_space<vmem>> -> memref<1x32xf32, #tpu.memory_space<vmem>>
    tpu.enqueue_dma source(%4 : memref<1x32xf32, #tpu.memory_space<any>>) target(%5 : memref<1x32xf32, #tpu.memory_space<vmem>>) target_semaphore(%arg4 : memref<!tpu.dma_semaphore, #tpu.memory_space<semaphore_mem>>)
    %c1_i32 = arith.constant 1 : i32
    %6 = arith.addi %0, %c1_i32 : i32
    %7 = arith.index_cast %6 : i32 to index
    %8 = memref.load %arg1[%7] : memref<16xi32, #tpu.memory_space<smem>>
    %c0_i32_3 = arith.constant 0 : i32
    %9 = tpu.memref_slice %arg2[%8, %c0_i32_3] : memref<16x32xf32, #tpu.memory_space<any>> -> memref<1x32xf32, #tpu.memory_space<any>>
    %c1_i32_4 = arith.constant 1 : i32
    %c0_i32_5 = arith.constant 0 : i32
    %10 = tpu.memref_slice %arg3[%c1_i32_4, %c0_i32_5] : memref<8x32xf32, #tpu.memory_space<vmem>> -> memref<1x32xf32, #tpu.memory_space<vmem>>
    tpu.enqueue_dma source(%9 : memref<1x32xf32, #tpu.memory_space<any>>) target(%10 : memref<1x32xf32, #tpu.memory_space<vmem>>) target_semaphore(%arg4 : memref<!tpu.dma_semaphore, #tpu.memory_space<semaphore_mem>>)
    %c2_i32 = arith.constant 2 : i32
    %11 = arith.addi %0, %c2_i32 : i32
    %12 = arith.index_cast %11 : i32 to index
    %13 = memref.load %arg1[%12] : memref<16xi32, #tpu.memory_space<smem>>
    %c0_i32_6 = arith.constant 0 : i32
    %14 = tpu.memref_slice %arg2[%13, %c0_i32_6] : memref<16x32xf32, #tpu.memory_space<any>> -> memref<1x32xf32, #tpu.memory_space<any>>
    %c2_i32_7 = arith.constant 2 : i32
    %c0_i32_8 = arith.constant 0 : i32
    %15 = tpu.memref_slice %arg3[%c2_i32_7, %c0_i32_8] : memref<8x32xf32, #tpu.memory_space<vmem>> -> memref<1x32xf32, #tpu.memory_space<vmem>>
    tpu.enqueue_dma source(%14 : memref<1x32xf32, #tpu.memory_space<any>>) target(%15 : memref<1x32xf32, #tpu.memory_space<vmem>>) target_semaphore(%arg4 : memref<!tpu.dma_semaphore, #tpu.memory_space<semaphore_mem>>)
    %c3_i32 = arith.constant 3 : i32
    %16 = arith.addi %0, %c3_i32 : i32
    %17 = arith.index_cast %16 : i32 to index
    %18 = memref.load %arg1[%17] : memref<16xi32, #tpu.memory_space<smem>>
    %c0_i32_9 = arith.constant 0 : i32
    %19 = tpu.memref_slice %arg2[%18, %c0_i32_9] : memref<16x32xf32, #tpu.memory_space<any>> -> memref<1x32xf32, #tpu.memory_space<any>>
    %c3_i32_10 = arith.constant 3 : i32
    %c0_i32_11 = arith.constant 0 : i32
    %20 = tpu.memref_slice %arg3[%c3_i32_10, %c0_i32_11] : memref<8x32xf32, #tpu.memory_space<vmem>> -> memref<1x32xf32, #tpu.memory_space<vmem>>
    tpu.enqueue_dma source(%19 : memref<1x32xf32, #tpu.memory_space<any>>) target(%20 : memref<1x32xf32, #tpu.memory_space<vmem>>) target_semaphore(%arg4 : memref<!tpu.dma_semaphore, #tpu.memory_space<semaphore_mem>>)
    %c4_i32 = arith.constant 4 : i32
    %21 = arith.addi %0, %c4_i32 : i32
    %22 = arith.index_cast %21 : i32 to index
    %23 = memref.load %arg1[%22] : memref<16xi32, #tpu.memory_space<smem>>
    %c0_i32_12 = arith.constant 0 : i32
    %24 = tpu.memref_slice %arg2[%23, %c0_i32_12] : memref<16x32xf32, #tpu.memory_space<any>> -> memref<1x32xf32, #tpu.memory_space<any>>
    %c4_i32_13 = arith.constant 4 : i32
    %c0_i32_14 = arith.constant 0 : i32
    %25 = tpu.memref_slice %arg3[%c4_i32_13, %c0_i32_14] : memref<8x32xf32, #tpu.memory_space<vmem>> -> memref<1x32xf32, #tpu.memory_space<vmem>>
    tpu.enqueue_dma source(%24 : memref<1x32xf32, #tpu.memory_space<any>>) target(%25 : memref<1x32xf32, #tpu.memory_space<vmem>>) target_semaphore(%arg4 : memref<!tpu.dma_semaphore, #tpu.memory_space<semaphore_mem>>)
    %c5_i32 = arith.constant 5 : i32
    %26 = arith.addi %0, %c5_i32 : i32
    %27 = arith.index_cast %26 : i32 to index
    %28 = memref.load %arg1[%27] : memref<16xi32, #tpu.memory_space<smem>>
    %c0_i32_15 = arith.constant 0 : i32
    %29 = tpu.memref_slice %arg2[%28, %c0_i32_15] : memref<16x32xf32, #tpu.memory_space<any>> -> memref<1x32xf32, #tpu.memory_space<any>>
    %c5_i32_16 = arith.constant 5 : i32
    %c0_i32_17 = arith.constant 0 : i32
    %30 = tpu.memref_slice %arg3[%c5_i32_16, %c0_i32_17] : memref<8x32xf32, #tpu.memory_space<vmem>> -> memref<1x32xf32, #tpu.memory_space<vmem>>
    tpu.enqueue_dma source(%29 : memref<1x32xf32, #tpu.memory_space<any>>) target(%30 : memref<1x32xf32, #tpu.memory_space<vmem>>) target_semaphore(%arg4 : memref<!tpu.dma_semaphore, #tpu.memory_space<semaphore_mem>>)
    %c6_i32 = arith.constant 6 : i32
    %31 = arith.addi %0, %c6_i32 : i32
    %32 = arith.index_cast %31 : i32 to index
    %33 = memref.load %arg1[%32] : memref<16xi32, #tpu.memory_space<smem>>
    %c0_i32_18 = arith.constant 0 : i32
    %34 = tpu.memref_slice %arg2[%33, %c0_i32_18] : memref<16x32xf32, #tpu.memory_space<any>> -> memref<1x32xf32, #tpu.memory_space<any>>
    %c6_i32_19 = arith.constant 6 : i32
    %c0_i32_20 = arith.constant 0 : i32
    %35 = tpu.memref_slice %arg3[%c6_i32_19, %c0_i32_20] : memref<8x32xf32, #tpu.memory_space<vmem>> -> memref<1x32xf32, #tpu.memory_space<vmem>>
    tpu.enqueue_dma source(%34 : memref<1x32xf32, #tpu.memory_space<any>>) target(%35 : memref<1x32xf32, #tpu.memory_space<vmem>>) target_semaphore(%arg4 : memref<!tpu.dma_semaphore, #tpu.memory_space<semaphore_mem>>)
    %c7_i32 = arith.constant 7 : i32
    %36 = arith.addi %0, %c7_i32 : i32
    %37 = arith.index_cast %36 : i32 to index
    %38 = memref.load %arg1[%37] : memref<16xi32, #tpu.memory_space<smem>>
    %c0_i32_21 = arith.constant 0 : i32
    %39 = tpu.memref_slice %arg2[%38, %c0_i32_21] : memref<16x32xf32, #tpu.memory_space<any>> -> memref<1x32xf32, #tpu.memory_space<any>>
    %c7_i32_22 = arith.constant 7 : i32
    %c0_i32_23 = arith.constant 0 : i32
    %40 = tpu.memref_slice %arg3[%c7_i32_22, %c0_i32_23] : memref<8x32xf32, #tpu.memory_space<vmem>> -> memref<1x32xf32, #tpu.memory_space<vmem>>
    tpu.enqueue_dma source(%39 : memref<1x32xf32, #tpu.memory_space<any>>) target(%40 : memref<1x32xf32, #tpu.memory_space<vmem>>) target_semaphore(%arg4 : memref<!tpu.dma_semaphore, #tpu.memory_space<semaphore_mem>>)
    %c0_i32_24 = arith.constant 0 : i32
    %c0_i32_25 = arith.constant 0 : i32
    %41 = tpu.memref_slice %arg2[%c0_i32_24, %c0_i32_25] : memref<16x32xf32, #tpu.memory_space<any>> -> memref<1x32xf32, #tpu.memory_space<any>>
    %c0_i32_26 = arith.constant 0 : i32
    %c0_i32_27 = arith.constant 0 : i32
    %42 = tpu.memref_slice %arg3[%c0_i32_26, %c0_i32_27] : memref<8x32xf32, #tpu.memory_space<vmem>> -> memref<1x32xf32, #tpu.memory_space<vmem>>
    tpu.wait_dma2 semaphore(%arg4 : memref<!tpu.dma_semaphore, #tpu.memory_space<semaphore_mem>>) src(%41 : memref<1x32xf32, #tpu.memory_space<any>>) dst(%42 : memref<1x32xf32, #tpu.memory_space<vmem>>)
    %c0_i32_28 = arith.constant 0 : i32
    %c0_i32_29 = arith.constant 0 : i32
    %43 = tpu.memref_slice %arg2[%c0_i32_28, %c0_i32_29] : memref<16x32xf32, #tpu.memory_space<any>> -> memref<1x32xf32, #tpu.memory_space<any>>
    %c1_i32_30 = arith.constant 1 : i32
    %c0_i32_31 = arith.constant 0 : i32
    %44 = tpu.memref_slice %arg3[%c1_i32_30, %c0_i32_31] : memref<8x32xf32, #tpu.memory_space<vmem>> -> memref<1x32xf32, #tpu.memory_space<vmem>>
    tpu.wait_dma2 semaphore(%arg4 : memref<!tpu.dma_semaphore, #tpu.memory_space<semaphore_mem>>) src(%43 : memref<1x32xf32, #tpu.memory_space<any>>) dst(%44 : memref<1x32xf32, #tpu.memory_space<vmem>>)
    %c0_i32_32 = arith.constant 0 : i32
    %c0_i32_33 = arith.constant 0 : i32
    %45 = tpu.memref_slice %arg2[%c0_i32_32, %c0_i32_33] : memref<16x32xf32, #tpu.memory_space<any>> -> memref<1x32xf32, #tpu.memory_space<any>>
    %c2_i32_34 = arith.constant 2 : i32
    %c0_i32_35 = arith.constant 0 : i32
    %46 = tpu.memref_slice %arg3[%c2_i32_34, %c0_i32_35] : memref<8x32xf32, #tpu.memory_space<vmem>> -> memref<1x32xf32, #tpu.memory_space<vmem>>
    tpu.wait_dma2 semaphore(%arg4 : memref<!tpu.dma_semaphore, #tpu.memory_space<semaphore_mem>>) src(%45 : memref<1x32xf32, #tpu.memory_space<any>>) dst(%46 : memref<1x32xf32, #tpu.memory_space<vmem>>)
    %c0_i32_36 = arith.constant 0 : i32
    %c0_i32_37 = arith.constant 0 : i32
    %47 = tpu.memref_slice %arg2[%c0_i32_36, %c0_i32_37] : memref<16x32xf32, #tpu.memory_space<any>> -> memref<1x32xf32, #tpu.memory_space<any>>
    %c3_i32_38 = arith.constant 3 : i32
    %c0_i32_39 = arith.constant 0 : i32
    %48 = tpu.memref_slice %arg3[%c3_i32_38, %c0_i32_39] : memref<8x32xf32, #tpu.memory_space<vmem>> -> memref<1x32xf32, #tpu.memory_space<vmem>>
    tpu.wait_dma2 semaphore(%arg4 : memref<!tpu.dma_semaphore, #tpu.memory_space<semaphore_mem>>) src(%47 : memref<1x32xf32, #tpu.memory_space<any>>) dst(%48 : memref<1x32xf32, #tpu.memory_space<vmem>>)
    %c0_i32_40 = arith.constant 0 : i32
    %c0_i32_41 = arith.constant 0 : i32
    %49 = tpu.memref_slice %arg2[%c0_i32_40, %c0_i32_41] : memref<16x32xf32, #tpu.memory_space<any>> -> memref<1x32xf32, #tpu.memory_space<any>>
    %c4_i32_42 = arith.constant 4 : i32
    %c0_i32_43 = arith.constant 0 : i32
    %50 = tpu.memref_slice %arg3[%c4_i32_42, %c0_i32_43] : memref<8x32xf32, #tpu.memory_space<vmem>> -> memref<1x32xf32, #tpu.memory_space<vmem>>
    tpu.wait_dma2 semaphore(%arg4 : memref<!tpu.dma_semaphore, #tpu.memory_space<semaphore_mem>>) src(%49 : memref<1x32xf32, #tpu.memory_space<any>>) dst(%50 : memref<1x32xf32, #tpu.memory_space<vmem>>)
    %c0_i32_44 = arith.constant 0 : i32
    %c0_i32_45 = arith.constant 0 : i32
    %51 = tpu.memref_slice %arg2[%c0_i32_44, %c0_i32_45] : memref<16x32xf32, #tpu.memory_space<any>> -> memref<1x32xf32, #tpu.memory_space<any>>
    %c5_i32_46 = arith.constant 5 : i32
    %c0_i32_47 = arith.constant 0 : i32
    %52 = tpu.memref_slice %arg3[%c5_i32_46, %c0_i32_47] : memref<8x32xf32, #tpu.memory_space<vmem>> -> memref<1x32xf32, #tpu.memory_space<vmem>>
    tpu.wait_dma2 semaphore(%arg4 : memref<!tpu.dma_semaphore, #tpu.memory_space<semaphore_mem>>) src(%51 : memref<1x32xf32, #tpu.memory_space<any>>) dst(%52 : memref<1x32xf32, #tpu.memory_space<vmem>>)
    %c0_i32_48 = arith.constant 0 : i32
    %c0_i32_49 = arith.constant 0 : i32
    %53 = tpu.memref_slice %arg2[%c0_i32_48, %c0_i32_49] : memref<16x32xf32, #tpu.memory_space<any>> -> memref<1x32xf32, #tpu.memory_space<any>>
    %c6_i32_50 = arith.constant 6 : i32
    %c0_i32_51 = arith.constant 0 : i32
    %54 = tpu.memref_slice %arg3[%c6_i32_50, %c0_i32_51] : memref<8x32xf32, #tpu.memory_space<vmem>> -> memref<1x32xf32, #tpu.memory_space<vmem>>
    tpu.wait_dma2 semaphore(%arg4 : memref<!tpu.dma_semaphore, #tpu.memory_space<semaphore_mem>>) src(%53 : memref<1x32xf32, #tpu.memory_space<any>>) dst(%54 : memref<1x32xf32, #tpu.memory_space<vmem>>)
    %c0_i32_52 = arith.constant 0 : i32
    %c0_i32_53 = arith.constant 0 : i32
    %55 = tpu.memref_slice %arg2[%c0_i32_52, %c0_i32_53] : memref<16x32xf32, #tpu.memory_space<any>> -> memref<1x32xf32, #tpu.memory_space<any>>
    %c7_i32_54 = arith.constant 7 : i32
    %c0_i32_55 = arith.constant 0 : i32
    %56 = tpu.memref_slice %arg3[%c7_i32_54, %c0_i32_55] : memref<8x32xf32, #tpu.memory_space<vmem>> -> memref<1x32xf32, #tpu.memory_space<vmem>>
    tpu.wait_dma2 semaphore(%arg4 : memref<!tpu.dma_semaphore, #tpu.memory_space<semaphore_mem>>) src(%55 : memref<1x32xf32, #tpu.memory_space<any>>) dst(%56 : memref<1x32xf32, #tpu.memory_space<vmem>>)
    return
  }
  func.func @transform_1(%arg0: i32, %arg1: memref<16xi32, #tpu.memory_space<smem>>) -> (i32, i32) {
    %c0_i32 = arith.constant 0 : i32
    %c0_i32_0 = arith.constant 0 : i32
    return %arg0, %c0_i32 : i32, i32
  }
}

</mosaic_0001>

<bundles_post_ra>
// kernel: tpu_custom_call.1
= control target key start
LH: loop header
LB: loop body
LE: loop exit
PB: predicated region body
PF: predicated region fallthrough
CT: control target
= control target key end

     0   :  { %s633_s9 = smov [#allocation4]   ;;  %s974_s0 = inlined_call_operand.hbm [shape: s32[16], index: 0, kind: input, shape index: {}]   ;;  %s975_s1 = inlined_call_operand.hbm [shape: f32[16,32], index: 1, kind: input, shape index: {}]   ;;  %s976_s2 = inlined_call_operand.hbm [shape: f32[16,32], index: 2, kind: output, shape index: {}]  }
   0x1   :  { %8 = dma.hbm_to_smem %s974_s0, 16, %s633_s9, [#allocation3] }
   0x2   :  { %611 = dma.done.wait [#allocation3], 16 }
   0x3   :  { %612 = vsyncadd [#allocation3], 4294967280 }
   0x4   :  { %10 = sfence }
   0x5   :  { %11 = vsyncpa [#allocation6], 0 }
   0x6   :  { %13 = vsyncpa [#allocation6 + $0x1], 0  ;;  %s653_s12 = smov 0   ;;  %s655_s13 = smov 0  }
   0x7   :  { %s657_s14 = smov 0  }
   0x8 LB: > { %s275_s0 = sadd.s32 4294967295, %s631_s14   ;;  %s670_s15 = sadd.s32 1, %s631_s14   ;;  %s631_s14 = sphi %s657_s14, %s986_s14   ;;  %s627_s13 = sphi %s655_s13, %s985_s13   ;;  %s623_s12 = sphi %s653_s12, %s984_s12  }
   0x9   : > { %s22_s16 = ssub.s32 %s631_s14, %s670_s15  ;;  %s25_s17 = sadd.s32 1, %s627_s13 }
   0xa   : > { %p23_p0 = scmp.eq.s32.totalorder %s22_s16, 0  ;;  %p276_p1 = scmp.ne.s32.totalorder %s22_s16, 0 }
   0xb   : > { %p29_p2 = scmp.eq.s32.totalorder %s631_s14, 1  ;;  %p34_p3 = scmp.ne.s32.totalorder %s627_s13, %s623_s12 }
   0xc   : > { %s679_s18 = scalar_select %p23_p0, %s627_s13, %s25_s17  }
   0xd   : > { %p681_p4 = por %p276_p1, %p29_p2  ;;  %p35_p5 = scmp.eq.s32.totalorder %s275_s0, 1 }
   0xe   : > { %p328_p6 = scmp.lt.s32.totalorder %s631_s14, 2  ;;  %s49_s21 = sand.u32 1, %s627_s13  }
   0xf   : > { %p686_p7 = por %p35_p5, %p34_p3  ;;  %s278_s22 = sshll.u32 %s49_s21, 3 }
  0x10   : > { %s694_s23 = sshll.u32 %s631_s14, 3  ;;  %s702_s27 = scalar_lea.vmem [#allocation5], %s278_s22 }
  0x11   : > { %s979_s20 = scalar_select %p686_p7, 1, 0 }
  0x12   : > { %s67_s24 = sadd.s32 1, %s694_s23  ;;  %s63_s28 = sshll.u32 %s702_s27, 4  ;;  %s706_s28 = int_to_ptr.vmem [resolvable:$true] %s63_s28 }
  0x13   : > { %s296_s25 = scalar_select %p328_p6, [#allocation4], [#allocation25] }
  0x14   : > { %s297_s26 = scalar_select %p328_p6, %s694_s23, 0 }
  0x15   : > { %s71_s29 = scalar_lea.vmem %s702_s27, 1 [#allocation5]  ;;  %s988_s24 = smov (!%p328_p6, %s67_s24), 0 }
  0x16   : > { %s53_s30 = sld [smem:[%s296_s25 + %s297_s26]]  ;;  %s79_s4 = sshll.u32 %s71_s29, 4  ;;  %s715_s4 = int_to_ptr.vmem [resolvable:$true] %s79_s4 }
  0x17   : > { %s299_s3 = scalar_select %p328_p6, [#allocation4], [#allocation26] }
  0x18   : > { %s83_s5 = sadd.s32 2, %s694_s23  ;;  %s87_s9 = scalar_lea.vmem %s702_s27, 2 [#allocation5] }
  0x19   : > { %s713_s6 = sld [smem:[%s299_s3 + %s988_s24]]  ;;  %s95_s16 = sshll.u32 %s87_s9, 4  ;;  %s759_s16 = int_to_ptr.vmem [resolvable:$true] %s95_s16 }
  0x1a   : > { %s719_s7 = scalar_select %p328_p6, [#allocation4], [#allocation27] }
  0x1b   : > { %s730_s25 = scalar_lea.hbm %s975_s1, 256 }
  0x1c   : > { %s280_s8 = sshll.u32 %s53_s30, 4 }
  0x1d   : > { %s55_s0 = scalar_lea.hbm %s975_s1, %s280_s8 }
  0x1e   : > { %s363_s17 = scalar_lea.hbm %s55_s0, 16  ;;  %p368_p11 = scmp.lt.s32.totalorder %s55_s0, %s975_s1 }
  0x1f   : > { %p364_p8 = scmp.ne.s32.totalorder %s55_s0, %s363_s17  ;;  %p369_p12 = scmp.lt.s32.totalorder %s730_s25, %s363_s17 }
  0x21   : > { %p365_p9 = pnand %p364_p8, %p328_p6  ;;  %p370_p13 = por %p369_p12, %p368_p11 }
  0x23   : > { %p366_p10 = pneg %p365_p9 }
  0x25   : > { %p371_p0 = pnand %p370_p13, %p366_p10 }
  0x27   : > { %374 = shalt.err (!%p371_p0)  }
  0x28   : > { %s375_s30 = scalar_lea.vmem %s706_s28, 16  ;;  %s634_s3 = smov [#allocation5]  }
  0x29   : > { %p376_p1 = scmp.ne.s32.totalorder %s706_s28, %s375_s30  ;;  %s379_s8 = sshll.u32 %s634_s3, 4  ;;  %s740_s8 = int_to_ptr.vmem [resolvable:$false] %s379_s8 }
  0x2a   : > { %s743_s9 = scalar_lea.vmem %s740_s8, 256  ;;  %p977_p5 = scmp.lt.s32.totalorder %s706_s28, %s740_s8 }
  0x2b   : > { %p377_p2 = pnand %p376_p1, %p328_p6  ;;  %p383_p8 = scmp.lt.s32.totalorder %s743_s9, %s375_s30 }
  0x2d   : > { %p378_p3 = pneg %p377_p2  ;;  %p384_p9 = por %p383_p8, %p977_p5 }
  0x2f   : > { %p385_p10 = pnand %p384_p9, %p378_p3 }
  0x31   : > { %388 = shalt.err (!%p385_p10)  }
  0x32   : > { %298 = dma.hbm_to_vmem [thread:$0]  (%p328_p6), %s55_s0, 16, %s706_s28, [#allocation2] }
  0x33   : > { %s990_s5 = smov (!%p328_p6, %s83_s5), 0  ;;  %s281_s10 = sshll.u32 %s713_s6, 4 }
  0x34   : > { %s70_s22 = scalar_lea.hbm %s975_s1, %s281_s10  ;;  %s765_s24 = sld [smem:[%s719_s7 + %s990_s5]] }
  0x35   : > { %s389_s26 = scalar_lea.hbm %s70_s22, 16  ;;  %p394_p0 = scmp.lt.s32.totalorder %s70_s22, %s975_s1 }
  0x36   : > { %p390_p11 = scmp.ne.s32.totalorder %s70_s22, %s389_s26  ;;  %p395_p1 = scmp.lt.s32.totalorder %s730_s25, %s389_s26 }
  0x38   : > { %p391_p12 = pnand %p390_p11, %p328_p6  ;;  %p396_p2 = por %p395_p1, %p394_p0 }
  0x3a   : > { %p392_p13 = pneg %p391_p12 }
  0x3c   : > { %p397_p3 = pnand %p396_p2, %p392_p13 }
  0x3e   : > { %400 = shalt.err (!%p397_p3)  }
  0x3f   : > { %s401_s5 = scalar_lea.vmem %s715_s4, 16  ;;  %p408_p11 = scmp.lt.s32.totalorder %s715_s4, %s740_s8 }
  0x40   : > { %p402_p8 = scmp.ne.s32.totalorder %s715_s4, %s401_s5  ;;  %p409_p12 = scmp.lt.s32.totalorder %s743_s9, %s401_s5 }
  0x42   : > { %p403_p9 = pnand %p402_p8, %p328_p6  ;;  %p410_p5 = por %p409_p12, %p408_p11 }
  0x44   : > { %p404_p10 = pneg %p403_p9 }
  0x46   : > { %p411_p7 = pnand %p410_p5, %p404_p10 }
  0x48   : > { %414 = shalt.err (!%p411_p7)  }
  0x49   : > { %301 = dma.hbm_to_vmem [thread:$0]  (%p328_p6), %s70_s22, 16, %s715_s4, [#allocation2] }
  0x4a   : > { %s99_s6 = sadd.s32 3, %s694_s23  ;;  %s103_s7 = scalar_lea.vmem %s702_s27, 3 [#allocation5] }
  0x4b   : > { %s305_s0 = scalar_select %p328_p6, [#allocation4], [#allocation28] }
  0x4c   : > { %s992_s6 = smov (!%p328_p6, %s99_s6), 0  ;;  %s111_s3 = sshll.u32 %s103_s7, 4  ;;  %s796_s3 = int_to_ptr.vmem [resolvable:$true] %s111_s3 }
  0x4d   : > { %s115_s10 = sadd.s32 4, %s694_s23  ;;  %s282_s11 = sshll.u32 %s765_s24, 4 }
  0x4e   : > { %s791_s17 = sld [smem:[%s305_s0 + %s992_s6]]  ;;  %s86_s30 = scalar_lea.hbm %s975_s1, %s282_s11 }
  0x4f   : > { %s415_s5 = scalar_lea.hbm %s86_s30, 16  ;;  %p420_p0 = scmp.lt.s32.totalorder %s86_s30, %s975_s1 }
  0x50   : > { %p416_p7 = scmp.ne.s32.totalorder %s86_s30, %s415_s5  ;;  %p421_p1 = scmp.lt.s32.totalorder %s730_s25, %s415_s5 }
  0x52   : > { %p417_p5 = pnand %p416_p7, %p328_p6  ;;  %p422_p2 = por %p421_p1, %p420_p0 }
  0x54   : > { %p418_p13 = pneg %p417_p5 }
  0x56   : > { %p423_p3 = pnand %p422_p2, %p418_p13 }
  0x58   : > { %426 = shalt.err (!%p423_p3)  }
  0x59   : > { %s427_s24 = scalar_lea.vmem %s759_s16, 16  ;;  %p434_p11 = scmp.lt.s32.totalorder %s759_s16, %s740_s8 }
  0x5a   : > { %p428_p8 = scmp.ne.s32.totalorder %s759_s16, %s427_s24  ;;  %p435_p12 = scmp.lt.s32.totalorder %s743_s9, %s427_s24 }
  0x5c   : > { %p429_p9 = pnand %p428_p8, %p328_p6  ;;  %p436_p7 = por %p435_p12, %p434_p11 }
  0x5e   : > { %p430_p10 = pneg %p429_p9 }
  0x60   : > { %p437_p5 = pnand %p436_p7, %p430_p10 }
  0x62   : > { %440 = shalt.err (!%p437_p5)  }
  0x63   : > { %304 = dma.hbm_to_vmem [thread:$0]  (%p328_p6), %s86_s30, 16, %s759_s16, [#allocation2] }
  0x64   : > { %s308_s6 = scalar_select %p328_p6, [#allocation4], [#allocation29] }
  0x65   : > { %s994_s10 = smov (!%p328_p6, %s115_s10), 0  ;;  %s119_s7 = scalar_lea.vmem %s702_s27, 4 [#allocation5] }
  0x66   : > { %s131_s0 = sadd.s32 5, %s694_s23  ;;  %s283_s11 = sshll.u32 %s791_s17, 4 }
  0x67   : > { %s821_s26 = sld [smem:[%s308_s6 + %s994_s10]]  ;;  %s102_s4 = scalar_lea.hbm %s975_s1, %s283_s11 }
  0x68   : > { %s127_s22 = sshll.u32 %s119_s7, 4  ;;  %s441_s24 = scalar_lea.hbm %s102_s4, 16  ;;  %s128_s22 = int_to_ptr.vmem [resolvable:$true] %s127_s22 }
  0x69   : > { %p442_p13 = scmp.ne.s32.totalorder %s102_s4, %s441_s24  ;;  %p446_p2 = scmp.lt.s32.totalorder %s102_s4, %s975_s1 }
  0x6a   : > { %p447_p3 = scmp.lt.s32.totalorder %s730_s25, %s441_s24 }
  0x6b   : > { %p443_p0 = pnand %p442_p13, %p328_p6 }
  0x6c   : > { %p448_p8 = por %p447_p3, %p446_p2 }
  0x6d   : > { %p444_p1 = pneg %p443_p0 }
  0x6f   : > { %p449_p9 = pnand %p448_p8, %p444_p1 }
  0x71   : > { %452 = shalt.err (!%p449_p9)  }
  0x72   : > { %s453_s10 = scalar_lea.vmem %s796_s3, 16  ;;  %p460_p7 = scmp.lt.s32.totalorder %s796_s3, %s740_s8 }
  0x73   : > { %p454_p10 = scmp.ne.s32.totalorder %s796_s3, %s453_s10  ;;  %p461_p5 = scmp.lt.s32.totalorder %s743_s9, %s453_s10 }
  0x75   : > { %p455_p11 = pnand %p454_p10, %p328_p6  ;;  %p462_p13 = por %p461_p5, %p460_p7 }
  0x77   : > { %p456_p12 = pneg %p455_p11 }
  0x79   : > { %p463_p0 = pnand %p462_p13, %p456_p12 }
  0x7b   : > { %466 = shalt.err (!%p463_p0)  }
  0x7c   : > { %307 = dma.hbm_to_vmem [thread:$0]  (%p328_p6), %s102_s4, 16, %s796_s3, [#allocation2] }
  0x7d   : > { %s135_s17 = scalar_lea.vmem %s702_s27, 5 [#allocation5]  ;;  %s996_s0 = smov (!%p328_p6, %s131_s0), 0 }
  0x7e   : > { %s311_s6 = scalar_select %p328_p6, [#allocation4], [#allocation30] }
  0x7f   : > { %s284_s7 = sshll.u32 %s821_s26, 4  ;;  %s143_s11 = sshll.u32 %s135_s17, 4  ;;  %s144_s11 = int_to_ptr.vmem [resolvable:$true] %s143_s11 }
  0x80   : > { %s118_s24 = scalar_lea.hbm %s975_s1, %s284_s7  ;;  %s851_s16 = sld [smem:[%s311_s6 + %s996_s0]] }
  0x81   : > { %s467_s30 = scalar_lea.hbm %s118_s24, 16  ;;  %p472_p8 = scmp.lt.s32.totalorder %s118_s24, %s975_s1 }
  0x82   : > { %p468_p1 = scmp.ne.s32.totalorder %s118_s24, %s467_s30  ;;  %p473_p9 = scmp.lt.s32.totalorder %s730_s25, %s467_s30 }
  0x84   : > { %p469_p2 = pnand %p468_p1, %p328_p6  ;;  %p474_p10 = por %p473_p9, %p472_p8 }
  0x86   : > { %p470_p3 = pneg %p469_p2 }
  0x88   : > { %p475_p11 = pnand %p474_p10, %p470_p3 }
  0x8a   : > { %478 = shalt.err (!%p475_p11)  }
  0x8b   : > { %s479_s26 = scalar_lea.vmem %s128_s22, 16  ;;  %p486_p13 = scmp.lt.s32.totalorder %s128_s22, %s740_s8 }
  0x8c   : > { %p480_p12 = scmp.ne.s32.totalorder %s128_s22, %s479_s26  ;;  %p487_p0 = scmp.lt.s32.totalorder %s743_s9, %s479_s26 }
  0x8e   : > { %p481_p7 = pnand %p480_p12, %p328_p6  ;;  %p488_p1 = por %p487_p0, %p486_p13 }
  0x90   : > { %p482_p5 = pneg %p481_p7 }
  0x92   : > { %p489_p2 = pnand %p488_p1, %p482_p5 }
  0x94   : > { %492 = shalt.err (!%p489_p2)  }
  0x95   : > { %310 = dma.hbm_to_vmem [thread:$0]  (%p328_p6), %s118_s24, 16, %s128_s22, [#allocation2] }
  0x96   : > { %s147_s0 = sadd.s32 6, %s694_s23  ;;  %s151_s17 = scalar_lea.vmem %s702_s27, 6 [#allocation5] }
  0x97   : > { %s314_s10 = scalar_select %p328_p6, [#allocation4], [#allocation31] }
  0x98   : > { %s998_s0 = smov (!%p328_p6, %s147_s0), 0  ;;  %s163_s6 = sadd.s32 7, %s694_s23 }
  0x99   : > { %s285_s7 = sshll.u32 %s851_s16, 4  ;;  %s148_s29 = sld [smem:[%s314_s10 + %s998_s0]] }
  0x9a   : > { %s134_s3 = scalar_lea.hbm %s975_s1, %s285_s7  ;;  %s159_s4 = sshll.u32 %s151_s17, 4  ;;  %s160_s4 = int_to_ptr.vmem [resolvable:$true] %s159_s4 }
  0x9b   : > { %s493_s26 = scalar_lea.hbm %s134_s3, 16  ;;  %p498_p10 = scmp.lt.s32.totalorder %s134_s3, %s975_s1 }
  0x9c   : > { %p494_p3 = scmp.ne.s32.totalorder %s134_s3, %s493_s26  ;;  %p499_p11 = scmp.lt.s32.totalorder %s730_s25, %s493_s26 }
  0x9e   : > { %p495_p8 = pnand %p494_p3, %p328_p6  ;;  %p500_p12 = por %p499_p11, %p498_p10 }
  0xa0   : > { %p496_p9 = pneg %p495_p8 }
  0xa2   : > { %p501_p7 = pnand %p500_p12, %p496_p9 }
  0xa4   : > { %504 = shalt.err (!%p501_p7)  }
  0xa5   : > { %s505_s23 = scalar_lea.vmem %s144_s11, 16  ;;  %p512_p1 = scmp.lt.s32.totalorder %s144_s11, %s740_s8 }
  0xa6   : > { %p506_p5 = scmp.ne.s32.totalorder %s144_s11, %s505_s23  ;;  %p513_p2 = scmp.lt.s32.totalorder %s743_s9, %s505_s23 }
  0xa8   : > { %p507_p13 = pnand %p506_p5, %p328_p6  ;;  %p514_p3 = por %p513_p2, %p512_p1 }
  0xaa   : > { %p508_p0 = pneg %p507_p13 }
  0xac   : > { %p515_p8 = pnand %p514_p3, %p508_p0 }
  0xae   : > { %518 = shalt.err (!%p515_p8)  }
  0xaf   : > { %313 = dma.hbm_to_vmem [thread:$0]  (%p328_p6), %s134_s3, 16, %s144_s11, [#allocation2] }
  0xb0   : > { %s317_s16 = scalar_select %p328_p6, [#allocation4], [#allocation32] }
  0xb1   : > { %s1000_s6 = smov (!%p328_p6, %s163_s6), 0  ;;  %s286_s0 = sshll.u32 %s148_s29, 4 }
  0xb2   : > { %s167_s10 = scalar_lea.vmem %s702_s27, 7 [#allocation5]  ;;  %s150_s5 = scalar_lea.hbm %s975_s1, %s286_s0 }
  0xb3   : > { %s164_s30 = sld [smem:[%s317_s16 + %s1000_s6]]  ;;  %s519_s26 = scalar_lea.hbm %s150_s5, 16 }
  0xb4   : > { %p520_p9 = scmp.ne.s32.totalorder %s150_s5, %s519_s26  ;;  %p524_p12 = scmp.lt.s32.totalorder %s150_s5, %s975_s1 }
  0xb5   : > { %p525_p7 = scmp.lt.s32.totalorder %s730_s25, %s519_s26 }
  0xb6   : > { %p521_p10 = pnand %p520_p9, %p328_p6 }
  0xb7   : > { %p526_p5 = por %p525_p7, %p524_p12 }
  0xb8   : > { %p522_p11 = pneg %p521_p10 }
  0xba   : > { %p527_p13 = pnand %p526_p5, %p522_p11 }
  0xbc   : > { %530 = shalt.err (!%p527_p13)  }
  0xbd   : > { %s531_s11 = scalar_lea.vmem %s160_s4, 16  ;;  %p538_p3 = scmp.lt.s32.totalorder %s160_s4, %s740_s8 }
  0xbe   : > { %p532_p0 = scmp.ne.s32.totalorder %s160_s4, %s531_s11  ;;  %p539_p8 = scmp.lt.s32.totalorder %s743_s9, %s531_s11 }
  0xc0   : > { %p533_p1 = pnand %p532_p0, %p328_p6  ;;  %p540_p9 = por %p539_p8, %p538_p3 }
  0xc2   : > { %p534_p2 = pneg %p533_p1 }
  0xc4   : > { %p541_p10 = pnand %p540_p9, %p534_p2 }
  0xc6   : > { %544 = shalt.err (!%p541_p10)  }
  0xc7   : > { %316 = dma.hbm_to_vmem [thread:$0]  (%p328_p6), %s150_s5, 16, %s160_s4, [#allocation2] }
  0xc8   : > { %s175_s27 = sshll.u32 %s167_s10, 4  ;;  %s287_s6 = sshll.u32 %s164_s30, 4  ;;  %s176_s27 = int_to_ptr.vmem [resolvable:$true] %s175_s27 }
  0xc9   : > { %s166_s23 = scalar_lea.hbm %s975_s1, %s287_s6 }
  0xca   : > { %s545_s16 = scalar_lea.hbm %s166_s23, 16  ;;  %p550_p5 = scmp.lt.s32.totalorder %s166_s23, %s975_s1 }
  0xcb   : > { %p546_p11 = scmp.ne.s32.totalorder %s166_s23, %s545_s16  ;;  %p551_p13 = scmp.lt.s32.totalorder %s730_s25, %s545_s16 }
  0xcd   : > { %p547_p12 = pnand %p546_p11, %p328_p6  ;;  %p552_p0 = por %p551_p13, %p550_p5 }
  0xcf   : > { %p548_p7 = pneg %p547_p12 }
  0xd1   : > { %p553_p1 = pnand %p552_p0, %p548_p7 }
  0xd3   : > { %556 = shalt.err (!%p553_p1)  }
  0xd4   : > { %s557_s4 = scalar_lea.vmem %s176_s27, 16  ;;  %p564_p9 = scmp.lt.s32.totalorder %s176_s27, %s740_s8 }
  0xd5   : > { %p558_p2 = scmp.ne.s32.totalorder %s176_s27, %s557_s4  ;;  %p565_p10 = scmp.lt.s32.totalorder %s743_s9, %s557_s4 }
  0xd7   : > { %p559_p3 = pnand %p558_p2, %p328_p6  ;;  %p566_p11 = por %p565_p10, %p564_p9 }
  0xd9   : > { %p560_p8 = pneg %p559_p3 }
  0xdb   : > { %p567_p12 = pnand %p566_p11, %p560_p8 }
  0xdd   : > { %570 = shalt.err (!%p567_p12)  }
  0xde   : > { %319 = dma.hbm_to_vmem [thread:$0]  (%p328_p6), %s166_s23, 16, %s176_s27, [#allocation2] }
  0xdf   : > { %614 = dma.done.wait (%p328_p6), [#allocation2], 128 }
  0xe0   : > { %616 = vsyncadd (%p328_p6), [#allocation2], 4294967168  ;;  %s289_s25 = sshll.u32 %s631_s14, 7  ;;  %p935_p7 = pnand %p328_p6, %p681_p4 }
  0xe1   : > { %s208_s5 = scalar_lea.hbm %s976_s2, %s289_s25  ;;  %s222_s26 = sand.u32 1, %s623_s12  }
  0xe2   : > { %s197_s22 = scalar_lea.sflag [#allocation6], %s49_s21  ;;  %s571_s24 = scalar_lea.vmem %s706_s28, 128 }
  0xe3   : > { %p572_p13 = scmp.ne.s32.totalorder %s706_s28, %s571_s24  ;;  %p573_p0 = pneg %p935_p7 }
  0xe4   : > { %p580_p3 = scmp.lt.s32.totalorder %s743_s9, %s571_s24  ;;  %p981_p8 = scmp.lt.s32.totalorder %s706_s28, %s740_s8 }
  0xe5   : > { %p574_p1 = pnand %p573_p0, %p572_p13 }
  0xe6   : > { %p581_p9 = por %p580_p3, %p981_p8 }
  0xe7   : > { %p575_p2 = pneg %p574_p1 }
  0xe9   : > { %p582_p10 = pnand %p581_p9, %p575_p2 }
  0xeb   : > { %585 = shalt.err (!%p582_p10)
}
  0xec   : > { %s586_s19 = scalar_lea.hbm %s208_s5, 128  ;;  %s591_s12 = scalar_lea.hbm %s976_s2, 256 }
  0xed   : > { %p587_p4 = scmp.ne.s32.totalorder %s208_s5, %s586_s19  ;;  %p592_p12 = scmp.lt.s32.totalorder %s208_s5, %s976_s2 }
  0xee   : > { %p593_p5 = scmp.lt.s32.totalorder %s591_s12, %s586_s19 }
  0xef   : > { %p589_p6 = pnand %p587_p4, %p573_p0 }
  0xf0   : > { %p594_p13 = por %p593_p5, %p592_p12 }
  0xf1   : > { %p590_p11 = pneg %p589_p6 }
  0xf3   : > { %p595_p1 = pnand %p594_p13, %p590_p11 }
  0xf5   : > { %598 = shalt.err (!%p595_p1)
}
  0xf6   : > { %323 = dma.vmem_to_hbm [thread:$0]  (!%p935_p7), %s706_s28, 128, %s208_s5, %s197_s22  }
  0xf7   : > { %p982_p0 = scmp.ne.s32.totalorder %s979_s20, 0  ;;  %p983_p2 = scmp.ge.s32.totalorder %s631_s14, 1 }
  0xf8   : > { %s223_s8 = scalar_lea.sflag [#allocation6], %s222_s26 }
  0xf9   : > { %p325_p3 = pnand %p983_p2, %p982_p0 }
  0xfb   : > { %p326_p8 = pneg %p325_p3 }
  0xfd   : > { %618 = dma.done.wait (%p326_p8), %s223_s8, 128  }
  0xfe   : > { %620 = vsyncadd (%p326_p8), %s223_s8, 4294967168  ;;  %p16_p5 = scmp.ge.s32.totalorder %s670_s15, 3   ;;  %s984_s12 = smov %s627_s13 }
  0xff   : > { %s985_s13 = smov %s679_s18  ;;  %s986_s14 = smov %s670_s15 }
 0x100   :  { %18 = sbr.rel (!%p16_p5) target bundleno = 8 (0x8), region = 91 }
 0x105   :  { %228 = vsyncpa [#allocation6], 1 }
 0x106   :  { %230 = vsyncpa [#allocation6 + $0x1], 1 }
 0x107   :  { %231 = vsyncmov [#allocation2] }
 0x10a   :  { %s232_s14 = vpop.sfrf %231 }
 0x10b   :  { %p292_p7 = scmp.ne.s32.totalorder %s232_s14, 0 }
 0x10d   :  { %236 = shalt.err (%p292_p7)  }

</bundles_post_ra>
